<compile_context>
chip_gen: v7x
topology: tpu7x:2x2x1
jax: 0.10.0
libtpu: 0.0.40
codegen_flags: <defaults>
</compile_context>

<pallas_src>
import numpy as np

import jax
import jax.numpy as jnp
from jax.experimental import pallas as pl
from jax.experimental.pallas import tpu as pltpu


def _round_up(x, m):
    return (x + m - 1) // m * m


# ------------------------------ slab layouts ---------------------------------
# All sections are 16-row aligned so bf16 sublane packing never crosses a tile
# boundary when we slice inside the kernel.

def _weight_layout(dims):
    F, H = dims["F"], dims["H"]
    sections = (("w_conv0", F), ("w_conv1", H), ("w_cls0a", H), ("w_cls0b", H),
                ("w_cls1", H), ("w_cls2", H // 2), ("bias", 5))
    offs, r = {}, 0
    for name, rows in sections:
        offs[name] = r
        r += _round_up(rows, 16)
    return offs, r


def _data_layout(dims):
    N0, N1, Bp = dims["N0"], dims["N1"], dims["Bp"]
    sections = (("adj0", N0), ("x", N0), ("S1", N1), ("adj1", N1), ("P1", Bp))
    offs, r = {}, 0
    for name, rows in sections:
        offs[name] = r
        r += _round_up(rows, 16)
    return offs, r


# ------------------------- single fused Pallas kernel ------------------------

def _make_kernel(dims):
    N0, N1, F, H, C, Bp = (dims[k] for k in ("N0", "N1", "F", "H", "C", "Bp"))
    H2 = H // 2
    d_offs, _ = _data_layout(dims)
    w_offs, _ = _weight_layout(dims)
    f32, bf16 = jnp.float32, jnp.bfloat16

    def kernel(d_ref, w_ref, o_ref):
        d = d_ref[0]          # [DATA_ROWS, DL]  bf16 graph-data slab (this batch)
        w = w_ref[...]        # [W_ROWS,  H]     bf16 weight slab (VMEM-resident)

        # --- static slices of the data slab (zero runtime cost views) ---
        adj0 = d[d_offs["adj0"]:d_offs["adj0"] + N0, :N0]      # [N0,N0]
        x    = d[d_offs["x"]:d_offs["x"] + N0, :F]             # [N0,F ]
        s1   = d[d_offs["S1"]:d_offs["S1"] + N1, :N0]          # [N1,N0]
        adj1 = d[d_offs["adj1"]:d_offs["adj1"] + N1, :N1]      # [N1,N1]
        p1   = d[d_offs["P1"]:d_offs["P1"] + Bp, :N1]          # [Bp,N1]

        # --- static slices of the weight slab ---
        w0   = w[w_offs["w_conv0"]:w_offs["w_conv0"] + F, :]   # [F ,H]
        w1   = w[w_offs["w_conv1"]:w_offs["w_conv1"] + H, :]   # [H ,H]
        wf0a = w[w_offs["w_cls0a"]:w_offs["w_cls0a"] + H, :]   # [H ,H]  (x_pool half)
        wf0b = w[w_offs["w_cls0b"]:w_offs["w_cls0b"] + H, :]   # [H ,H]  (h1 half)
        wf1  = w[w_offs["w_cls1"]:w_offs["w_cls1"] + H, :]     # [H ,H]  (cols >=H2 are 0)
        wf2  = w[w_offs["w_cls2"]:w_offs["w_cls2"] + H2, :]    # [H2,H]  (cols >=C are 0)
        bias = w[w_offs["bias"]:w_offs["bias"] + 8, :].astype(f32)
        b_c0, b_c1, b_f0, b_f1, b_f2 = (bias[i:i + 1] for i in range(5))

        # ---- GCN conv 0: relu(A0_hat @ (X @ W0) + b0)    (bf16 MXU, f32 acc)
        xw0 = jnp.dot(x, w0, preferred_element_type=f32)
        h0 = jnp.maximum(
            jnp.dot(adj0, xw0.astype(bf16), preferred_element_type=f32) + b_c0, 0.0)

        # ---- SEPooling (aggr='add') + ReLU: relu(S1 @ h0)
        xp = jnp.maximum(
            jnp.dot(s1, h0.astype(bf16), preferred_element_type=f32), 0.0)   # [N1,H]

        # ---- GCN conv 1: relu(A1_hat @ (xp @ W1) + b1)
        xw1 = jnp.dot(xp.astype(bf16), w1, preferred_element_type=f32)
        h1 = jnp.maximum(
            jnp.dot(adj1, xw1.astype(bf16), preferred_element_type=f32) + b_c1, 0.0)

        # ---- global sum-pool of both level-1 activations.  No lane concat:
        #      classifier layer 0 becomes two accumulated dots (review item 2).
        px = jnp.dot(p1, xp.astype(bf16), preferred_element_type=f32)        # [Bp,H]
        ph = jnp.dot(p1, h1.astype(bf16), preferred_element_type=f32)        # [Bp,H]

        # ---- classifier MLP (dropout = identity in eval), f32 elementwise
        c0 = jnp.maximum(
            jnp.dot(px.astype(bf16), wf0a, preferred_element_type=f32)
            + jnp.dot(ph.astype(bf16), wf0b, preferred_element_type=f32)
            + b_f0, 0.0)
        c1 = jnp.maximum(
            jnp.dot(c0.astype(bf16), wf1, preferred_element_type=f32) + b_f1, 0.0)
        logits = (jnp.dot(c1[:, :H2].astype(bf16), wf2,
                          preferred_element_type=f32) + b_f2)[:, :C]          # [Bp,C]

        # ---- numerically stable log_softmax (f32)
        m = jnp.max(logits, axis=-1, keepdims=True)
        s = logits - m
        lse = jnp.log(jnp.sum(jnp.exp(s), axis=-1, keepdims=True))
        o_ref[0] = s - lse

    return kernel


def sep_forward(data_slab, weight_slab, dims):
    """Fused, batched SEP.forward.  data_slab: [NB, DATA_ROWS, DL] bf16,
    weight_slab: [W_ROWS, H] bf16.  Returns [NB*Bp, C] f32 log-probs."""
    NB, data_rows, data_lanes = data_slab.shape
    w_rows, w_lanes = weight_slab.shape
    Bp, C, H, F, N0, N1 = (dims[k] for k in ("Bp", "C", "H", "F", "N0", "N1"))

    flops_per_step = 2 * (N0 * F * H + N0 * N0 * H + N1 * N0 * H
                          + N1 * H * H + N1 * N1 * H
                          + 2 * Bp * N1 * H + 2 * Bp * H * H
                          + Bp * H * (H // 2) + Bp * (H // 2) * C)
    cost = pl.CostEstimate(
        flops=NB * flops_per_step,
        transcendentals=NB * Bp * (C + 1),
        bytes_accessed=data_slab.size * 2 + weight_slab.size * 2 + NB * Bp * C * 4)

    out = pl.pallas_call(
        _make_kernel(dims),
        out_shape=jax.ShapeDtypeStruct((NB, Bp, C), jnp.float32),
        grid_spec=pltpu.PrefetchScalarGridSpec(
            num_scalar_prefetch=0,
            grid=(NB,),
            in_specs=[
                # per-batch graph-data slab: one lane-contiguous DMA per step
                pl.BlockSpec((1, data_rows, data_lanes), lambda b: (b, 0, 0)),
                # weight slab: constant block index -> stays resident in VMEM
                pl.BlockSpec((w_rows, w_lanes), lambda b: (0, 0)),
            ],
            out_specs=pl.BlockSpec((1, Bp, C), lambda b: (b, 0, 0)),
        ),
        compiler_params=pltpu.CompilerParams(
            dimension_semantics=("parallel",)),   # v7x: 2 TCs split the batch
        cost_estimate=cost,
    )(data_slab, weight_slab)
    return out.reshape(NB * Bp, C)


# ------------------------------- slab packing --------------------------------

def pack_weight_slab(params, dims):
    F, H, C = dims["F"], dims["H"], dims["C"]
    H2 = H // 2
    offs, total = _weight_layout(dims)
    slab = jnp.zeros((total, H), jnp.float32)
    slab = slab.at[offs["w_conv0"]:offs["w_conv0"] + F, :].set(params["w_conv0"])
    slab = slab.at[offs["w_conv1"]:offs["w_conv1"] + H, :].set(params["w_conv1"])
    # classifier layer 0 split into the two halves of the (pooled_xp | pooled_h1) concat
    slab = slab.at[offs["w_cls0a"]:offs["w_cls0a"] + H, :].set(params["w_cls0"][:H])
    slab = slab.at[offs["w_cls0b"]:offs["w_cls0b"] + H, :].set(params["w_cls0"][H:])
    slab = slab.at[offs["w_cls1"]:offs["w_cls1"] + H, :H2].set(params["w_cls1"])
    slab = slab.at[offs["w_cls2"]:offs["w_cls2"] + H2, :C].set(params["w_cls2"])
    b = offs["bias"]
    slab = slab.at[b + 0, :H].set(params["b_conv0"][0])
    slab = slab.at[b + 1, :H].set(params["b_conv1"][0])
    slab = slab.at[b + 2, :H].set(params["b_cls0"][0])
    slab = slab.at[b + 3, :H2].set(params["b_cls1"][0])
    slab = slab.at[b + 4, :C].set(params["b_cls2"][0])
    return slab.astype(jnp.bfloat16)


def pack_data_slab(data, dims):
    N0, N1, F, Bp = dims["N0"], dims["N1"], dims["F"], dims["Bp"]
    DL = dims["data_lanes"]
    offs, total = _data_layout(dims)
    NB = data["adj0"].shape[0]
    slab = jnp.zeros((NB, total, DL), jnp.float32)
    slab = slab.at[:, offs["adj0"]:offs["adj0"] + N0, :N0].set(data["adj0"])
    slab = slab.at[:, offs["x"]:offs["x"] + N0, :F].set(data["node_features"])
    slab = slab.at[:, offs["S1"]:offs["S1"] + N1, :N0].set(data["S1"])
    slab = slab.at[:, offs["adj1"]:offs["adj1"] + N1, :N1].set(data["adj1"])
    slab = slab.at[:, offs["P1"]:offs["P1"] + Bp, :N1].set(data["P1"])
    return slab.astype(jnp.bfloat16)


# ---------------------------------- glue -------------------------------------

def gcn_normalize(adj):
    """A_hat = D^{-1/2} (A + I) D^{-1/2} (dense, symmetric-normalized)."""
    a = adj + np.eye(adj.shape[0], dtype=np.float32)
    deg = a.sum(axis=1)
    dinv = np.where(deg > 0, 1.0 / np.sqrt(deg), 0.0).astype(np.float32)
    return (a * dinv[:, None] * dinv[None, :]).astype(np.float32)


def make_params(key, num_features, nhid, num_classes, num_convs):
    keys = jax.random.split(key, 10)

    def glorot(k, shape):
        fan_in, fan_out = shape
        lim = jnp.sqrt(6.0 / (fan_in + fan_out))
        return jax.random.uniform(k, shape, jnp.float32, -lim, lim)

    params = {
        "w_conv0": glorot(keys[0], (num_features, nhid)),
        "b_conv0": jnp.zeros((1, nhid), jnp.float32),
        "w_conv1": glorot(keys[1], (nhid, nhid)),
        "b_conv1": jnp.zeros((1, nhid), jnp.float32),
    }
    init_dim = nhid * num_convs
    params["w_cls0"] = glorot(keys[2], (init_dim, nhid))
    params["b_cls0"] = jax.random.uniform(keys[3], (1, nhid), jnp.float32, -0.1, 0.1)
    params["w_cls1"] = glorot(keys[4], (nhid, nhid // 2))
    params["b_cls1"] = jax.random.uniform(keys[5], (1, nhid // 2), jnp.float32, -0.1, 0.1)
    params["w_cls2"] = glorot(keys[6], (nhid // 2, num_classes))
    params["b_cls2"] = jax.random.uniform(keys[7], (1, num_classes), jnp.float32, -0.1, 0.1)
    return params


def make_batch_data(key, num_batches, num_graphs, n0_per_graph, n1_per_graph,
                    num_features):
    """NB independent graph-batches, each a 2-level hierarchy of ring graphs.
    Each level-1 (coarse) node owns 2 consecutive level-0 (fine) nodes."""
    N0 = num_graphs * n0_per_graph
    N1 = num_graphs * n1_per_graph

    node_features = jax.random.normal(key, (num_batches, N0, num_features),
                                      jnp.float32)

    adj0 = np.zeros((N0, N0), np.float32)
    for g in range(num_graphs):
        off = g * n0_per_graph
        for i in range(n0_per_graph):
            j = (i + 1) % n0_per_graph
            adj0[off + i, off + j] = 1.0
            adj0[off + j, off + i] = 1.0

    adj1 = np.zeros((N1, N1), np.float32)
    for g in range(num_graphs):
        off = g * n1_per_graph
        for i in range(n1_per_graph):
            j = (i + 1) % n1_per_graph
            adj1[off + i, off + j] = 1.0
            adj1[off + j, off + i] = 1.0

    S1 = np.zeros((N1, N0), np.float32)
    for c in range(N1):
        S1[c, 2 * c] = 1.0
        S1[c, 2 * c + 1] = 1.0

    P1 = np.zeros((num_graphs, N1), np.float32)
    for g in range(num_graphs):
        P1[g, g * n1_per_graph:(g + 1) * n1_per_graph] = 1.0

    rep = lambda a: jnp.broadcast_to(jnp.asarray(a), (num_batches,) + a.shape)
    return {
        "node_features": node_features,
        "adj0": rep(gcn_normalize(adj0)),
        "adj1": rep(gcn_normalize(adj1)),
        "S1": rep(S1),
        "P1": rep(P1),
    }


def sep_reference(params, data):
    """Pure-JAX reference (f32 math, params/data rounded to bf16 like the kernel)."""
    f32 = jnp.float32
    bf = lambda a: jnp.asarray(a, jnp.bfloat16).astype(f32)

    def one(adj0, x, s1, adj1, p1):
        h0 = jax.nn.relu(bf(adj0) @ (bf(x) @ bf(params["w_conv0"])) + bf(params["b_conv0"]))
        xp = jax.nn.relu(bf(s1) @ h0)
        h1 = jax.nn.relu(bf(adj1) @ (xp @ bf(params["w_conv1"])) + bf(params["b_conv1"]))
        pooled = jnp.concatenate([bf(p1) @ xp, bf(p1) @ h1], axis=1)
        c0 = jax.nn.relu(pooled @ bf(params["w_cls0"]) + bf(params["b_cls0"]))
        c1 = jax.nn.relu(c0 @ bf(params["w_cls1"]) + bf(params["b_cls1"]))
        logits = c1 @ bf(params["w_cls2"]) + bf(params["b_cls2"])
        return jax.nn.log_softmax(logits, axis=-1)

    out = jax.vmap(one)(data["adj0"], data["node_features"], data["S1"],
                        data["adj1"], data["P1"])
    return out.reshape(-1, out.shape[-1])


if __name__ == "__main__":
    num_features = 16
    nhid = 32
    num_classes = 3
    num_convs = 2
    num_batches = 4          # grid length (leading "parallel" axis)
    graphs_per_batch = 2
    n0_per_graph = 8         # level-0 nodes per graph
    n1_per_graph = 4         # level-1 (coarse) nodes per graph

    key = jax.random.PRNGKey(0)
    k_data, k_params = jax.random.split(key)

    data = make_batch_data(k_data, num_batches, graphs_per_batch,
                           n0_per_graph, n1_per_graph, num_features)
    params = make_params(k_params, num_features, nhid, num_classes, num_convs)

    N0 = graphs_per_batch * n0_per_graph
    N1 = graphs_per_batch * n1_per_graph
    dims = dict(N0=N0, N1=N1, F=num_features, H=nhid, C=num_classes,
                Bp=graphs_per_batch, data_lanes=max(N0, num_features))

    d_slab = pack_data_slab(data, dims)       # [NB, 80, 16] bf16
    w_slab = pack_weight_slab(params, dims)   # [176, 32]    bf16

    fwd = jax.jit(lambda d, w: sep_forward(d, w, dims))
    out = jax.block_until_ready(fwd(d_slab, w_slab))

    assert out.shape == (num_batches * graphs_per_batch, num_classes)
    # rows of log_softmax must exp-sum to 1
    assert bool(jnp.allclose(jnp.exp(out).sum(axis=-1), 1.0, atol=1e-4))
    # match the pure-JAX reference (tolerance covers bf16 rounding only)
    ref = sep_reference(params, data)
    assert bool(jnp.allclose(out, ref, atol=0.2)), float(jnp.max(jnp.abs(out - ref)))
    print("KERNEL_OK")
</pallas_src>

<mosaic_0001>
module attributes {stable_mosaic.version = 11 : i64} {
  func.func @kernel(%arg0: i32, %arg1: memref<1x80x16xbf16, #tpu.memory_space<vmem>>, %arg2: memref<176x32xbf16, #tpu.memory_space<vmem>>, %arg3: memref<1x2x3xf32, #tpu.memory_space<vmem>>) attributes {dimension_semantics = [#tpu.dimension_semantics<parallel>], iteration_bounds = array<i64: 4>, scalar_prefetch = 0 : i64, scratch_operands = 0 : i64, tpu.core_type = #tpu.core_type<tc>, window_params = [{transform_indices = @transform_0, window_bounds = array<i64: 1, 80, 16>}, {pipeline_mode = #tpu.pipeline_mode<synchronous>, transform_indices = @transform_1, window_bounds = array<i64: 176, 32>}, {transform_indices = @transform_2, window_bounds = array<i64: 1, 2, 3>}]} {
    %c0 = arith.constant 0 : index
    %c0_0 = arith.constant 0 : index
    %c0_1 = arith.constant 0 : index
    %0 = vector.load %arg1[%c0, %c0_0, %c0_1] : memref<1x80x16xbf16, #tpu.memory_space<vmem>>, vector<1x80x16xbf16>
    %1 = vector.shape_cast %0 : vector<1x80x16xbf16> to vector<80x16xbf16>
    %c0_2 = arith.constant 0 : index
    %c0_3 = arith.constant 0 : index
    %2 = vector.load %arg2[%c0_2, %c0_3] : memref<176x32xbf16, #tpu.memory_space<vmem>>, vector<176x32xbf16>
    %3 = vector.extract_strided_slice %1 {offsets = [0, 0], sizes = [16, 16], strides = [1, 1]} : vector<80x16xbf16> to vector<16x16xbf16>
    %4 = vector.extract_strided_slice %1 {offsets = [16, 0], sizes = [16, 16], strides = [1, 1]} : vector<80x16xbf16> to vector<16x16xbf16>
    %5 = vector.extract_strided_slice %1 {offsets = [32, 0], sizes = [8, 16], strides = [1, 1]} : vector<80x16xbf16> to vector<8x16xbf16>
    %6 = vector.extract_strided_slice %1 {offsets = [48, 0], sizes = [8, 8], strides = [1, 1]} : vector<80x16xbf16> to vector<8x8xbf16>
    %7 = vector.extract_strided_slice %1 {offsets = [64, 0], sizes = [2, 8], strides = [1, 1]} : vector<80x16xbf16> to vector<2x8xbf16>
    %8 = vector.extract_strided_slice %2 {offsets = [0, 0], sizes = [16, 32], strides = [1, 1]} : vector<176x32xbf16> to vector<16x32xbf16>
    %9 = vector.extract_strided_slice %2 {offsets = [16, 0], sizes = [32, 32], strides = [1, 1]} : vector<176x32xbf16> to vector<32x32xbf16>
    %10 = vector.extract_strided_slice %2 {offsets = [48, 0], sizes = [32, 32], strides = [1, 1]} : vector<176x32xbf16> to vector<32x32xbf16>
    %11 = vector.extract_strided_slice %2 {offsets = [80, 0], sizes = [32, 32], strides = [1, 1]} : vector<176x32xbf16> to vector<32x32xbf16>
    %12 = vector.extract_strided_slice %2 {offsets = [112, 0], sizes = [32, 32], strides = [1, 1]} : vector<176x32xbf16> to vector<32x32xbf16>
    %13 = vector.extract_strided_slice %2 {offsets = [144, 0], sizes = [16, 32], strides = [1, 1]} : vector<176x32xbf16> to vector<16x32xbf16>
    %14 = vector.extract_strided_slice %2 {offsets = [160, 0], sizes = [8, 32], strides = [1, 1]} : vector<176x32xbf16> to vector<8x32xbf16>
    %15 = arith.extf %14 : vector<8x32xbf16> to vector<8x32xf32>
    %16 = vector.extract_strided_slice %15 {offsets = [0, 0], sizes = [1, 32], strides = [1, 1]} : vector<8x32xf32> to vector<1x32xf32>
    %17 = vector.extract_strided_slice %15 {offsets = [1, 0], sizes = [1, 32], strides = [1, 1]} : vector<8x32xf32> to vector<1x32xf32>
    %18 = vector.extract_strided_slice %15 {offsets = [2, 0], sizes = [1, 32], strides = [1, 1]} : vector<8x32xf32> to vector<1x32xf32>
    %19 = vector.extract_strided_slice %15 {offsets = [3, 0], sizes = [1, 32], strides = [1, 1]} : vector<8x32xf32> to vector<1x32xf32>
    %20 = vector.extract_strided_slice %15 {offsets = [4, 0], sizes = [1, 32], strides = [1, 1]} : vector<8x32xf32> to vector<1x32xf32>
    %cst = arith.constant dense<0.000000e+00> : vector<16x32xf32>
    %21 = tpu.matmul %4, %8, %cst {dimension_numbers = #tpu.dot_dimension_numbers<[1], [0], [0], [1], [0, 0, 1, 1], [], []>} : vector<16x16xbf16>, vector<16x32xbf16>, vector<16x32xf32> -> vector<16x32xf32>
    %22 = arith.truncf %21 : vector<16x32xf32> to vector<16x32xbf16>
    %cst_4 = arith.constant dense<0.000000e+00> : vector<16x32xf32>
    %23 = tpu.matmul %3, %22, %cst_4 {dimension_numbers = #tpu.dot_dimension_numbers<[1], [0], [0], [1], [0, 0, 1, 1], [], []>} : vector<16x16xbf16>, vector<16x32xbf16>, vector<16x32xf32> -> vector<16x32xf32>
    %24 = vector.broadcast %16 : vector<1x32xf32> to vector<16x32xf32>
    %25 = arith.addf %23, %24 : vector<16x32xf32>
    %cst_5 = arith.constant 0.000000e+00 : f32
    %26 = vector.broadcast %cst_5 : f32 to vector<16x32xf32>
    %27 = arith.maximumf %25, %26 : vector<16x32xf32>
    %28 = arith.truncf %27 : vector<16x32xf32> to vector<16x32xbf16>
    %cst_6 = arith.constant dense<0.000000e+00> : vector<8x32xf32>
    %29 = tpu.matmul %5, %28, %cst_6 {dimension_numbers = #tpu.dot_dimension_numbers<[1], [0], [0], [1], [0, 0, 1, 1], [], []>} : vector<8x16xbf16>, vector<16x32xbf16>, vector<8x32xf32> -> vector<8x32xf32>
    %cst_7 = arith.constant 0.000000e+00 : f32
    %30 = vector.broadcast %cst_7 : f32 to vector<8x32xf32>
    %31 = arith.maximumf %29, %30 : vector<8x32xf32>
    %32 = arith.truncf %31 : vector<8x32xf32> to vector<8x32xbf16>
    %cst_8 = arith.constant dense<0.000000e+00> : vector<8x32xf32>
    %33 = tpu.matmul %32, %9, %cst_8 {dimension_numbers = #tpu.dot_dimension_numbers<[1], [0], [0], [1], [0, 0, 1, 1], [], []>} : vector<8x32xbf16>, vector<32x32xbf16>, vector<8x32xf32> -> vector<8x32xf32>
    %34 = arith.truncf %33 : vector<8x32xf32> to vector<8x32xbf16>
    %cst_9 = arith.constant dense<0.000000e+00> : vector<8x32xf32>
    %35 = tpu.matmul %6, %34, %cst_9 {dimension_numbers = #tpu.dot_dimension_numbers<[1], [0], [0], [1], [0, 0, 1, 1], [], []>} : vector<8x8xbf16>, vector<8x32xbf16>, vector<8x32xf32> -> vector<8x32xf32>
    %36 = vector.broadcast %17 : vector<1x32xf32> to vector<8x32xf32>
    %37 = arith.addf %35, %36 : vector<8x32xf32>
    %cst_10 = arith.constant 0.000000e+00 : f32
    %38 = vector.broadcast %cst_10 : f32 to vector<8x32xf32>
    %39 = arith.maximumf %37, %38 : vector<8x32xf32>
    %40 = arith.truncf %31 : vector<8x32xf32> to vector<8x32xbf16>
    %cst_11 = arith.constant dense<0.000000e+00> : vector<2x32xf32>
    %41 = tpu.matmul %7, %40, %cst_11 {dimension_numbers = #tpu.dot_dimension_numbers<[1], [0], [0], [1], [0, 0, 1, 1], [], []>} : vector<2x8xbf16>, vector<8x32xbf16>, vector<2x32xf32> -> vector<2x32xf32>
    %42 = arith.truncf %39 : vector<8x32xf32> to vector<8x32xbf16>
    %cst_12 = arith.constant dense<0.000000e+00> : vector<2x32xf32>
    %43 = tpu.matmul %7, %42, %cst_12 {dimension_numbers = #tpu.dot_dimension_numbers<[1], [0], [0], [1], [0, 0, 1, 1], [], []>} : vector<2x8xbf16>, vector<8x32xbf16>, vector<2x32xf32> -> vector<2x32xf32>
    %44 = arith.truncf %41 : vector<2x32xf32> to vector<2x32xbf16>
    %cst_13 = arith.constant dense<0.000000e+00> : vector<2x32xf32>
    %45 = tpu.matmul %44, %10, %cst_13 {dimension_numbers = #tpu.dot_dimension_numbers<[1], [0], [0], [1], [0, 0, 1, 1], [], []>} : vector<2x32xbf16>, vector<32x32xbf16>, vector<2x32xf32> -> vector<2x32xf32>
    %46 = arith.truncf %43 : vector<2x32xf32> to vector<2x32xbf16>
    %cst_14 = arith.constant dense<0.000000e+00> : vector<2x32xf32>
    %47 = tpu.matmul %46, %11, %cst_14 {dimension_numbers = #tpu.dot_dimension_numbers<[1], [0], [0], [1], [0, 0, 1, 1], [], []>} : vector<2x32xbf16>, vector<32x32xbf16>, vector<2x32xf32> -> vector<2x32xf32>
    %48 = arith.addf %45, %47 : vector<2x32xf32>
    %49 = vector.broadcast %18 : vector<1x32xf32> to vector<2x32xf32>
    %50 = arith.addf %48, %49 : vector<2x32xf32>
    %cst_15 = arith.constant 0.000000e+00 : f32
    %51 = vector.broadcast %cst_15 : f32 to vector<2x32xf32>
    %52 = arith.maximumf %50, %51 : vector<2x32xf32>
    %53 = arith.truncf %52 : vector<2x32xf32> to vector<2x32xbf16>
    %cst_16 = arith.constant dense<0.000000e+00> : vector<2x32xf32>
    %54 = tpu.matmul %53, %12, %cst_16 {dimension_numbers = #tpu.dot_dimension_numbers<[1], [0], [0], [1], [0, 0, 1, 1], [], []>} : vector<2x32xbf16>, vector<32x32xbf16>, vector<2x32xf32> -> vector<2x32xf32>
    %55 = vector.broadcast %19 : vector<1x32xf32> to vector<2x32xf32>
    %56 = arith.addf %54, %55 : vector<2x32xf32>
    %cst_17 = arith.constant 0.000000e+00 : f32
    %57 = vector.broadcast %cst_17 : f32 to vector<2x32xf32>
    %58 = arith.maximumf %56, %57 : vector<2x32xf32>
    %59 = vector.extract_strided_slice %58 {offsets = [0, 0], sizes = [2, 16], strides = [1, 1]} : vector<2x32xf32> to vector<2x16xf32>
    %60 = arith.truncf %59 : vector<2x16xf32> to vector<2x16xbf16>
    %cst_18 = arith.constant dense<0.000000e+00> : vector<2x32xf32>
    %61 = tpu.matmul %60, %13, %cst_18 {dimension_numbers = #tpu.dot_dimension_numbers<[1], [0], [0], [1], [0, 0, 1, 1], [], []>} : vector<2x16xbf16>, vector<16x32xbf16>, vector<2x32xf32> -> vector<2x32xf32>
    %62 = vector.broadcast %20 : vector<1x32xf32> to vector<2x32xf32>
    %63 = arith.addf %61, %62 : vector<2x32xf32>
    %64 = vector.extract_strided_slice %63 {offsets = [0, 0], sizes = [2, 3], strides = [1, 1]} : vector<2x32xf32> to vector<2x3xf32>
    %cst_19 = arith.constant dense<0xFF800000> : vector<2xf32>
    %65 = vector.multi_reduction <maximumf>, %64, %cst_19 [1] : vector<2x3xf32> to vector<2xf32>
    %66 = vector.shape_cast %65 : vector<2xf32> to vector<2x1xf32>
    %67 = vector.broadcast %66 : vector<2x1xf32> to vector<2x3xf32>
    %68 = arith.subf %64, %67 : vector<2x3xf32>
    %69 = math.exp %68 : vector<2x3xf32>
    %cst_20 = arith.constant dense<0.000000e+00> : vector<2xf32>
    %70 = vector.multi_reduction <add>, %69, %cst_20 [1] : vector<2x3xf32> to vector<2xf32>
    %71 = vector.shape_cast %70 : vector<2xf32> to vector<2x1xf32>
    %72 = math.log %71 : vector<2x1xf32>
    %73 = vector.broadcast %72 : vector<2x1xf32> to vector<2x3xf32>
    %74 = arith.subf %68, %73 : vector<2x3xf32>
    %c0_21 = arith.constant 0 : index
    %c0_22 = arith.constant 0 : index
    %c0_23 = arith.constant 0 : index
    %75 = vector.load %arg3[%c0_21, %c0_22, %c0_23] : memref<1x2x3xf32, #tpu.memory_space<vmem>>, vector<1x2x3xf32>
    %76 = vector.shape_cast %75 : vector<1x2x3xf32> to vector<2x3xf32>
    %77 = vector.shape_cast %74 : vector<2x3xf32> to vector<1x2x3xf32>
    tpu.vector_store %arg3[%c0_21, %c0_22, %c0_23], %77 {strides = array<i32>} : memref<1x2x3xf32, #tpu.memory_space<vmem>>, vector<1x2x3xf32>,
    return
  }
  func.func @transform_0(%arg0: i32) -> (i32, i32, i32) {
    %c0_i32 = arith.constant 0 : i32
    %c0_i32_0 = arith.constant 0 : i32
    %c0_i32_1 = arith.constant 0 : i32
    return %arg0, %c0_i32, %c0_i32_0 : i32, i32, i32
  }
  func.func @transform_1(%arg0: i32) -> (i32, i32) {
    %c0_i32 = arith.constant 0 : i32
    %c0_i32_0 = arith.constant 0 : i32
    %c0_i32_1 = arith.constant 0 : i32
    return %c0_i32, %c0_i32_0 : i32, i32
  }
  func.func @transform_2(%arg0: i32) -> (i32, i32, i32) {
    %c0_i32 = arith.constant 0 : i32
    %c0_i32_0 = arith.constant 0 : i32
    %c0_i32_1 = arith.constant 0 : i32
    return %arg0, %c0_i32, %c0_i32_0 : i32, i32, i32
  }
}

</mosaic_0001>

<bundles_post_ra>
// kernel: _lambda_.1
= control target key start
LH: loop header
LB: loop body
LE: loop exit
PB: predicated region body
PF: predicated region fallthrough
CT: control target
= control target key end

     0   :  { %s1013_s9 = smov 0   ;;  %s1142_s0 = inlined_call_operand.vmem [shape: bf16[4,80,16], index: 0, kind: input, shape index: {}]   ;;  %s1143_s1 = inlined_call_operand.vmem [shape: bf16[176,32], index: 1, kind: input, shape index: {}]   ;;  %s1144_s2 = inlined_call_operand.vmem [shape: f32[4,2,3], index: 2, kind: output, shape index: {}]  }
   0x1 LB: > { %s829_s10 = sadd.s32 4294967295, %s994_s9   ;;  %p833_p0 = scmp.ge.s32.totalorder %s994_s9, 1  ;;  %s994_s9 = sphi %s1013_s9, %s12_s9  }
   0x2   : > { %p112_p1 = scmp.lt.s32.totalorder %s994_s9, 5 }
   0x4   : > { %p113_p2 = pnand %p833_p0, %p112_p1 }
   0x5   : > { %v972_v0 = vld [vmem:[%s1143_s1] sm:$0xff] (!%p113_p2)   ;;  %v996_v1 = vmov (!%p113_p2), 0.0   ;;  %p133_p3 = scmp.lt.s32.totalorder (!%p113_p2), %s829_s10, 3  ;;  %vm997_vm0 = vmmov (!%p113_p2), 0   ;;  %vm183_vm1 = vcmask (!%p113_p2), 130048   ;;  %v975_v9 = vld [vmem:[%s1143_s1 + $0x8] sm:$0xff] (!%p113_p2)   ;;  %v229_v10 = vlaneseq (!%p113_p2) }
   0x6   : > { %116 = sbr.rel (%p113_p2) target bundleno = 2299 (0x8fb), region = 28  ;;  %887 = vmatprep.subr.bf16.mxu0 (!%p113_p2), %v996_v1  ;;  %893 = vmatprep.subr.bf16.mxu1 (!%p113_p2), %v996_v1  ;;  %v170_v12 = vld [vmem:[%s1143_s1 + $0x50] sm:$0xf] (!%p113_p2)  ;;  %vm395_vm2 = vcmask (!%p113_p2), 1043456   ;;  %vm342_vm3 = vcmask (!%p113_p2), 261120   ;;  %vm391_vm4 = vcmask (!%p113_p2), 64512  }
   0x7   : > { %888 = vmatpush3.bf16.msra.mxu0 (!%p113_p2), %v972_v0  ;;  %889 = vmatprep.mubr.msk.bf16.mxu0 (!%p113_p2), %vm997_vm0, %v996_v1  ;;  %v1052_v11 = vshrl.u32 (!%p113_p2), %v229_v10, 7  ;;  %v1057_v13 = vunpack.c.l.bf16 (!%p113_p2), %v170_v12  ;;  %v976_v26 = vld [vmem:[%s1143_s1 + $0x10] sm:$0xff] (!%p113_p2)   ;;  %v977_v42 = vld [vmem:[%s1143_s1 + $0x28] sm:$0xff] (!%p113_p2)   ;;  %v978_v53 = vld [vmem:[%s1143_s1 + $0x18] sm:$0xff] (!%p113_p2)   ;;  %vm762_vm5 = vcmask (!%p113_p2), 17408  }
   0x8   : > { %895 = vmatprep.mubr.msk.bf16.mxu1 (!%p113_p2), %vm997_vm0, %v996_v1  ;;  %899 = vmatprep.subr.bf16.mxu0 (!%p113_p2), %v996_v1  ;;  %v980_v54 = vld [vmem:[%s1143_s1 + $0x20] sm:$0xff] (!%p113_p2)   ;;  %v979_v57 = vld [vmem:[%s1143_s1 + $0x30] sm:$0xff] (!%p113_p2)  }
   0x9   : > { %v231_v14 = vsub.s32 (!%p113_p2), 0, %v1052_v11  ;;  %v389_v43 = vsub.s32 (!%p113_p2), 1, %v1052_v11 }
   0xb   : > { %v232_v15 = vrot.slane (!%p113_p2), %v1057_v13, %v231_v14  ;;  %v390_v44 = vrot.slane (!%p113_p2), %v1057_v13, %v389_v43 }
   0xd   : > { %s1146_s10 = smov (!%p133_p3, %s829_s10), 3 }
   0xe   : > { %s961_s13 = smul.u32 40, %s1146_s10  ;;  %s835_s11 = sshll.u32 %s1146_s10, 1 }
   0xf   : > { %s141_s14 = scalar_lea.vmem %s1144_s2, %s835_s11 }
  0x10   : > { %s1037_s16 = scalar_lea.vmem %s1142_s0, %s961_s13 }
  0x11   : > { %v973_v2 = vld [vmem:[%s1037_s16 + $0x8] sm:$0xff]   ;;  %v974_v8 = vld [vmem:[%s1037_s16] sm:$0xff]   ;;  %v147_v25 = vld [vmem:[%s1037_s16 + $0x10] sm:$0xf] }
  0x12   : > { %890 = vmatmul.mubr.msk.bf16.vlgmr.msra.gmra.mrb[0].mxu0 %vm183_vm1, %v973_v2  ;;  %v148_v40 = vld [vmem:[%s1037_s16 + $0x18] sm:$0xf]  ;;  %v149_v41 = vld [vmem:[%s1037_s16 + $0x20] sm:$0xf] }
  0x13   : > { %901 = vmatprep.mubr.msk.bf16.mxu0 %vm997_vm0, %v996_v1 }
  0xe5   : > { %v221_v3 = vpop.f32.mrb[0].mxu0 }
  0xe6   : > { %v891_v4 = vpop.f32.mrb[1].mxu0 }
  0xe7   : > { %v224_v5 = vpop.f32.mrb[2].mxu0 }
  0xe8   : > { %v228_v6 = vpack.c.bf16 %v224_v5, %v221_v3  ;;  %v892_v7 = vpop.f32.mrb[3].mxu0 }
  0xea   : > { %894 = vmatpush3.bf16.msra.mxu1 %v228_v6  ;;  %v981_v6 = vld [vmem:[%s1143_s1 + $0x38] sm:$0xff]  }
  0xeb   : > { %905 = vmatprep.subr.bf16.mxu1 %v996_v1 }
  0xed   : > { %896 = vmatmul.mubr.msk.bf16.vlgmr.msra.gmra.mrb[0].mxu1 %vm183_vm1, %v974_v8  ;;  %v982_v8 = vld [vmem:[%s1143_s1 + $0x40] sm:$0xff]  }
  0xee   : > { %909 = vmatprep.mubr.msk.bf16.mxu1 %vm997_vm0, %v996_v1  ;;  %906 = vmatpush3.bf16.msra.mxu1 %v975_v9  ;;  %v643_v9 = vsub.s32 2, %v1052_v11 }
  0xef   : > { %907 = vmatprep.subr.bf16.mxu1 %v996_v1 }
  0xf0   : > { %v644_v10 = vrot.slane %v1057_v13, %v643_v9 }
  0xf2   : > { %908 = vmatpush3.bf16.msra.mxu1 %v976_v26 }
  0xf3   : > { %919 = vmatprep.subr.bf16.mxu1 %v996_v1 }
 0x1c0   : > { %v275_v16 = vpop.f32.mrb[0].mxu1 }
 0x1c1   : > { %v276_v17 = vadd.f32 %v275_v16, %v232_v15  ;;  %v897_v18 = vpop.f32.mrb[1].mxu1 }
 0x1c2   : > { %v278_v19 = vpop.f32.mrb[2].mxu1 }
 0x1c3   : > { %v279_v20 = vadd.f32 %v278_v19, %v232_v15  ;;  %v898_v21 = vpop.f32.mrb[3].mxu1  ;;  %v282_v22 = vmax.f32 %v276_v17, 0.0 }
 0x1c4   : > { %v650_v21 = vsub.s32 3, %v1052_v11 }
 0x1c5   : > { %v283_v23 = vmax.f32 %v279_v20, 0.0 }
 0x1c7   : > { %v284_v24 = vpack.c.bf16 %v283_v23, %v282_v22  ;;  %v651_v22 = vrot.slane %v1057_v13, %v650_v21 }
 0x1c9   : > { %900 = vmatpush3.bf16.msra.mxu0 %v284_v24 }
 0x1ca   : > { %913 = vmatprep.subr.bf16.mxu0 %v996_v1 }
 0x1cc   : > { %902 = vmatmul.mubr.msk.bf16.vlgmr.msra.gmra.mrb[4].mxu0 %vm183_vm1, %v147_v25 }
 0x1cd   : > { %915 = vmatprep.mubr.msk.bf16.mxu0 %vm997_vm0, %v996_v1 }
 0x29f   : > { %v322_v27 = vpop.f32.mrb[4].mxu0 }
 0x2a0   : > { %v328_v28 = vmax.f32 %v322_v27, 0.0  ;;  %v903_v29 = vpop.f32.mrb[5].mxu0 }
 0x2a1   : > { %v325_v30 = vpop.f32.mrb[6].mxu0 }
 0x2a2   : > { %v329_v31 = vpack.c.bf16 %v328_v28, %v328_v28  ;;  %v904_v32 = vpop.f32.mrb[7].mxu0  ;;  %v711_v30 = vsub.s32 4, %v1052_v11 }
 0x2a4   : > { %v443_v33 = vsel %vm395_vm2, %v329_v31, 0  ;;  %910 = vmatmul.mubr.msk.bf16.vlgmr.msra.gmra.mrb[4].mxu1 %vm342_vm3, %v329_v31  ;;  %v712_v31 = vrot.slane %v1057_v13, %v711_v30 }
 0x2a5   : > { %920 = vmatpush3.bf16.msra.mxu1 %v443_v33  ;;  %921 = vmatprep.mubr.msk.bf16.mxu1 %vm997_vm0, %v996_v1 }
 0x2a6   : > { %931 = vmatprep.subr.bf16.mxu1 %v996_v1 }
 0x2ac   : > { %922 = vmatmul.mubr.msk.bf16.vlgmr.msra.gmra.mrb[8].mxu1 %vm391_vm4, %v149_v41 }
 0x2ad   : > { %935 = vmatprep.mubr.msk.bf16.mxu1 %vm997_vm0, %v996_v1  ;;  %932 = vmatpush3.bf16.msra.mxu1 %v977_v42 }
 0x2ae   : > { %933 = vmatprep.subr.bf16.mxu1 %v996_v1 }
 0x2b1   : > { %934 = vmatpush3.bf16.msra.mxu1 %v979_v57 }
 0x2b2   : > { %947 = vmatprep.subr.bf16.mxu1 %v996_v1 }
 0x377   : > { %v380_v34 = vpop.f32.mrb[4].mxu1 }
 0x378   : > { %v386_v35 = vpack.c.bf16 %v380_v34, %v380_v34  ;;  %v911_v36 = vpop.f32.mrb[5].mxu1 }
 0x379   : > { %v383_v37 = vpop.f32.mrb[6].mxu1 }
 0x37a   : > { %v397_v38 = vsel %vm395_vm2, %v386_v35, 0  ;;  %v912_v39 = vpop.f32.mrb[7].mxu1 }
 0x37b   : > { %914 = vmatpush3.bf16.msra.mxu0 %v397_v38 }
 0x37c   : > { %925 = vmatprep.subr.bf16.mxu0 %v996_v1 }
 0x37e   : > { %916 = vmatmul.mubr.msk.bf16.vlgmr.msra.gmra.mrb[8].mxu0 %vm391_vm4, %v148_v40 }
 0x37f   : > { %927 = vmatprep.mubr.msk.bf16.mxu0 %vm997_vm0, %v996_v1  ;;  %v479_v55 = vpop.f32.mrb[8].mxu1 }
 0x380   : > { %v529_v56 = vpack.c.bf16 %v479_v55, %v479_v55  ;;  %v923_v58 = vpop.f32.mrb[9].mxu1 }
 0x381   : > { %v482_v59 = vpop.f32.mrb[10].mxu1 }
 0x382   : > { %v924_v60 = vpop.f32.mrb[11].mxu1 }
 0x451   : > { %v433_v45 = vpop.f32.mrb[8].mxu0 }
 0x452   : > { %v434_v46 = vadd.f32 %v433_v45, %v390_v44  ;;  %v917_v47 = vpop.f32.mrb[9].mxu0 }
 0x453   : > { %v436_v48 = vpop.f32.mrb[10].mxu0 }
 0x454   : > { %v439_v49 = vmax.f32 %v434_v46, 0.0  ;;  %v918_v50 = vpop.f32.mrb[11].mxu0 }
 0x456   : > { %v485_v51 = vpack.c.bf16 %v439_v49, %v439_v49 }
 0x458   : > { %v487_v52 = vsel %vm395_vm2, %v485_v51, 0 }
 0x459   : > { %926 = vmatpush3.bf16.msra.mxu0 %v487_v52 }
 0x45a   : > { %939 = vmatprep.subr.bf16.mxu0 %v996_v1 }
 0x45c   : > { %928 = vmatmul.mubr.msk.bf16.vlgmr.msra.gmra.mrb[12].mxu0 %vm391_vm4, %v149_v41 }
 0x45d   : > { %940 = vmatpush3.bf16.msra.mxu0 %v978_v53  ;;  %943 = vmatprep.mubr.msk.bf16.mxu0 %vm997_vm0, %v996_v1 }
 0x45e   : > { %941 = vmatprep.subr.bf16.mxu0 %v996_v1 }
 0x461   : > { %942 = vmatpush3.bf16.msra.mxu0 %v980_v54 }
 0x462   : > { %955 = vmatprep.subr.bf16.mxu0 %v996_v1 }
 0x464   : > { %944 = vmatmul.mubr.msk.bf16.vlgmr.msra.gmra.mrb[16].mxu0 %vm342_vm3, %v529_v56 }
 0x465   : > { %957 = vmatprep.mubr.msk.bf16.mxu0 %vm997_vm0, %v996_v1 }
 0x52f   : > { %v523_v61 = vpop.f32.mrb[12].mxu0 }
 0x530   : > { %v530_v62 = vpack.c.bf16 %v523_v61, %v523_v61  ;;  %v929_v63 = vpop.f32.mrb[13].mxu0 }
 0x531   : > { %v526_v0 = vpop.f32.mrb[14].mxu0 }
 0x532   : > { %936 = vmatmul.mubr.msk.bf16.vlgmr.msra.gmra.mrb[12].mxu1 %vm342_vm3, %v530_v62  ;;  %v930_v2 = vpop.f32.mrb[15].mxu0 }
 0x533   : > { %951 = vmatprep.mubr.msk.bf16.mxu1 %vm997_vm0, %v996_v1  ;;  %948 = vmatpush3.bf16.msra.mxu1 %v981_v6 }
 0x534   : > { %949 = vmatprep.subr.bf16.mxu1 %v996_v1  ;;  %v983_v1 = vld [vmem:[%s1143_s1 + $0x48] sm:$0xff]  }
 0x535   : > { %956 = vmatpush3.bf16.msra.mxu0 %v983_v1 }
 0x537   : > { %v635_v3 = vpop.f32.mrb[16].mxu0  ;;  %950 = vmatpush3.bf16.msra.mxu1 %v982_v8 }
 0x538   : > { %v945_v4 = vpop.f32.mrb[17].mxu0 }
 0x539   : > { %v638_v5 = vpop.f32.mrb[18].mxu0 }
 0x53a   : > { %v946_v7 = vpop.f32.mrb[19].mxu0 }
 0x605   : > { %v580_v12 = vpop.f32.mrb[12].mxu1 }
 0x606   : > { %v636_v14 = vadd.f32 %v635_v3, %v580_v12  ;;  %v937_v15 = vpop.f32.mrb[13].mxu1 }
 0x607   : > { %v583_v16 = vpop.f32.mrb[14].mxu1 }
 0x608   : > { %v645_v17 = vadd.f32 %v644_v10, %v636_v14  ;;  %v938_v18 = vpop.f32.mrb[15].mxu1 }
 0x60a   : > { %v646_v19 = vmax.f32 %v645_v17, 0.0 }
 0x60c   : > { %v647_v20 = vpack.c.bf16 %v646_v19, %v646_v19 }
 0x60e   : > { %952 = vmatmul.mubr.msk.bf16.vlgmr.msra.gmra.mrb[16].mxu1 %vm342_vm3, %v647_v20 }
 0x6e1   : > { %v701_v23 = vpop.f32.mrb[16].mxu1 }
 0x6e2   : > { %v702_v24 = vadd.f32 %v701_v23, %v651_v22  ;;  %v953_v25 = vpop.f32.mrb[17].mxu1 }
 0x6e3   : > { %v704_v26 = vpop.f32.mrb[18].mxu1 }
 0x6e4   : > { %v707_v27 = vmax.f32 %v702_v24, 0.0  ;;  %v954_v28 = vpop.f32.mrb[19].mxu1 }
 0x6e6   : > { %v708_v29 = vpack.c.bf16 %v707_v27, %v707_v27 }
 0x6e8   : > { %958 = vmatmul.mubr.msk.bf16.vlgmr.msra.gmra.mrb[20].mxu0 %vm183_vm1, %v708_v29 }
 0x7bb   : > { %v756_v32 = vpop.f32.mrb[20].mxu0 }
 0x7bc   : > { %v757_v33 = vadd.f32 %v756_v32, %v712_v31  ;;  %v959_v34 = vpop.f32.mrb[21].mxu0 }
 0x7bd   : > { %v759_v35 = vpop.f32.mrb[22].mxu0 }
 0x7be   : > { %v763_v36 = vsel %vm762_vm5, %v757_v33, -inf  ;;  %v960_v37 = vpop.f32.mrb[23].mxu0 }
 0x7bf   : > { %764 = vmax.xlane.f32.xlu0 %v763_v36 }
 0x84c   : > { %v765_v38 = vpop.xlane.xlu0 %764 }
 0x84d   : > { %v766_v39 = vsub.f32 %v757_v33, %v765_v38 }
 0x84f   : > { %v767_v40 = vmul.f32 1.442695, %v766_v39 }
 0x851   : > { %984 = vpow2.f32 %v767_v40 }
 0x85b   : > { %v985_v41 = vpop.eup %984 }
 0x85c   : > { %v769_v42 = vsel %vm762_vm5, %v985_v41, 0.0 }
 0x85d   : > { %770 = vadd.xlane.f32.xlu0 %v769_v42 }
 0x8ea   : > { %v771_v11 = vpop.xlane.xlu0 %770 }
 0x8eb   : > { %986 = vlog2.f32 %v771_v11 }
 0x8f5   : > { %v987_v13 = vpop.eup %986 }
 0x8f6   : > { %v773_v43 = vmul.f32 0.6931472, %v987_v13 }
 0x8f8   : > { %v774_v44 = vsub.f32 %v766_v39, %v773_v43 }
 0x8fa   : > { %775 = vst.msk [vmem:[%s141_s14] sm:$0x3] %vm762_vm5, %v774_v44 }
 0x8fb PF: > { %s12_s9 = sadd.s32 1, %s994_s9  }
 0x8fc   : > { %p9_p4 = scmp.ge.s32.totalorder %s12_s9, 6  }
 0x8fe   :  { %11 = sbr.rel (!%p9_p4) target bundleno = 1 (0x1), region = 58 }

</bundles_post_ra>
